<compile_context>
chip_gen: v7x
topology: tpu7x:2x2x1
jax: 0.10.0
libtpu: 0.0.40
codegen_flags: <defaults>
</compile_context>

<pallas_src>
import functools

import jax
import jax.numpy as jnp
from jax.experimental import pallas as pl
from jax.experimental.pallas import tpu as pltpu


def _round_up(x: int, m: int) -> int:
    return (x + m - 1) // m * m


def _fused_mlp_kernel(*refs, num_layers: int, compute_dtype, pack: int,
                      out_f: int):
    """refs = (x_ref, w0, b0, w1, b1, ..., o_ref). Full MLP on one batch tile."""
    x_ref = refs[0]
    o_ref = refs[-1]
    wb = refs[1:-1]

    # Cast the activation to the MXU operand dtype ONCE and keep it in
    # compute_dtype between layers (halves live vreg/VMEM footprint vs f32).
    h = x_ref[...].astype(compute_dtype)
    for i in range(num_layers):                         # unrolled at trace time
        w = wb[2 * i][...]                              # (in, out) compute_dtype
        b = wb[2 * i + 1][...]                          # (1, out)  float32
        y = jnp.dot(h, w, preferred_element_type=jnp.float32)   # f32 accumulate
        y = y + b                                       # bias add in f32
        if i < num_layers - 1:
            h = jnp.maximum(y, 0.0).astype(compute_dtype)  # ReLU, then narrow
        else:
            h = y                                       # final layer: no ReLU

    out = h.astype(o_ref.dtype)                         # (bb, out_f)
    if pack == 1:
        o_ref[...] = out
    else:
        # Lane-dense output: o_ref is (bb//pack, pack*out_f). Contiguous row
        # chunk j of the tile is stored at lane offset j*out_f, so the
        # HBM-writeback DMA reads a dense (.., 128) tile instead of a
        # 16/128 lane-sparse one.  (Sliced stores chosen as the most
        # conservative lowering; a jnp.concatenate + single full-width store
        # would additionally remove the vst lane masking.)
        m = out.shape[0] // pack
        for j in range(pack):
            o_ref[:, j * out_f:(j + 1) * out_f] = out[j * m:(j + 1) * m, :]


def simple_mlp_forward(x, params, *, compute_dtype=jnp.bfloat16, block_b=1024,
                       vmem_limit_bytes=None):
    """x: (B, in) float32; params: [(w_i (in,out) f32, b_i (1,out) f32), ...]."""
    B, in_f = x.shape
    num_layers = len(params)
    out_f = params[-1][0].shape[1]

    # Pack `pack` batch rows into the 128-lane dim of the output so the store /
    # writeback path is lane-dense (out_f=16 would otherwise use 16/128 lanes).
    pack = 128 // out_f if (8 <= out_f < 128 and 128 % out_f == 0) else 1

    # --- batch tiling: pad only to the required alignment, not to block_b ----
    if B <= block_b:
        n_tiles = 1
        align = max(8, pack)                 # single full-extent block
    else:
        n_tiles = pl.cdiv(B, block_b)
        # tiled blocks need (bb // pack) to be a multiple of 8 sublanes
        align = 8 * pack if pack > 1 else 8
    bb = _round_up(pl.cdiv(B, n_tiles), align)
    Bp = n_tiles * bb
    pad = Bp - B
    xp = jnp.pad(x, ((0, pad), (0, 0))) if pad else x
    grid = (n_tiles,)

    # --- flatten weights/biases; weights in compute_dtype (bf16 fast path) ---
    flat_wb = []
    in_specs = [pl.BlockSpec((bb, in_f), lambda i: (i, 0))]       # activations
    for (w, b) in params:
        w_c = w.astype(compute_dtype)
        b_c = b.astype(jnp.float32)
        flat_wb += [w_c, b_c]
        # Full-extent, batch-invariant blocks: fetched once, resident in VMEM
        # across all grid steps (weight-stationary).
        in_specs.append(pl.BlockSpec(w_c.shape, lambda i: (0, 0)))
        in_specs.append(pl.BlockSpec(b_c.shape, lambda i: (0, 0)))

    if pack > 1:
        out_shape = jax.ShapeDtypeStruct((Bp // pack, pack * out_f), x.dtype)
        out_spec = pl.BlockSpec((bb // pack, pack * out_f), lambda i: (i, 0))
    else:
        out_shape = jax.ShapeDtypeStruct((Bp, out_f), x.dtype)
        out_spec = pl.BlockSpec((bb, out_f), lambda i: (i, 0))

    flops = int(2 * Bp * sum(w.shape[0] * w.shape[1] for w, _ in params))
    bytes_accessed = int(
        xp.size * xp.dtype.itemsize
        + sum(a.size * a.dtype.itemsize for a in flat_wb)
        + Bp * out_f * x.dtype.itemsize)

    kernel = functools.partial(_fused_mlp_kernel,
                               num_layers=num_layers,
                               compute_dtype=compute_dtype,
                               pack=pack, out_f=out_f)
    out = pl.pallas_call(
        kernel,
        out_shape=out_shape,
        grid=grid,
        in_specs=in_specs,
        out_specs=out_spec,
        compiler_params=pltpu.CompilerParams(
            dimension_semantics=("parallel",),
            vmem_limit_bytes=vmem_limit_bytes),
        cost_estimate=pl.CostEstimate(flops=flops, transcendentals=0,
                                      bytes_accessed=bytes_accessed),
    )(xp, *flat_wb)

    if pack > 1:
        # Un-fold the lane-packed layout back to (Bp, out_f): cheap XLA-side
        # layout plumbing (reshape + transpose) outside the kernel.
        out = out.reshape(n_tiles, bb // pack, pack, out_f)
        out = out.transpose(0, 2, 1, 3).reshape(Bp, out_f)
    return out[:B] if pad else out


def init_simple_mlp_params(layer_sizes, key):
    """Deterministic init mimicking nn.Linear default: U(-1/sqrt(fan_in), +)."""
    params = []
    for i in range(len(layer_sizes) - 1):
        fan_in, fan_out = layer_sizes[i], layer_sizes[i + 1]
        key, wk, bk = jax.random.split(key, 3)
        bound = 1.0 / jnp.sqrt(fan_in)
        # Stored as (in, out) == W_pt.T so y = x @ W + b maps straight to MXU.
        w = jax.random.uniform(wk, (fan_in, fan_out), jnp.float32,
                               minval=-bound, maxval=bound)
        b = jax.random.uniform(bk, (1, fan_out), jnp.float32,
                               minval=-bound, maxval=bound)
        params.append((w, b))
    return params


def simple_mlp_reference(x, params):
    """Plain-JAX f32 reference matching SimpleMLP.forward."""
    n = len(params)
    for i, (w, b) in enumerate(params):
        x = x @ w + b
        if i < n - 1:
            x = jnp.maximum(x, 0.0)
    return x


if __name__ == "__main__":
    layer_sizes = [32, 64, 48, 16]
    batch = 8

    key = jax.random.PRNGKey(0)
    key, xkey = jax.random.split(key)
    x = jax.random.normal(xkey, (batch, layer_sizes[0]), jnp.float32)
    params = init_simple_mlp_params(layer_sizes, key)
    ref = simple_mlp_reference(x, params)

    # 1) f32 operands / f32 accumulate -> tight tolerance vs reference.
    out_f32 = jax.block_until_ready(
        simple_mlp_forward(x, params, compute_dtype=jnp.float32))
    assert out_f32.shape == (batch, layer_sizes[-1])
    assert jnp.allclose(out_f32, ref, atol=1e-5, rtol=1e-5), "f32 mismatch"

    # 2) Fast path: bf16 operands on the MXU, f32 accumulation.
    out_bf16 = jax.block_until_ready(simple_mlp_forward(x, params))
    assert out_bf16.shape == (batch, layer_sizes[-1])
    assert jnp.allclose(out_bf16, ref, atol=3e-2, rtol=3e-2), "bf16 mismatch"

    # 3) Odd batch, single full-extent tile: B=300 pads to 304 rows (was 512).
    big_b = 300
    key, bkey = jax.random.split(key)
    xb = jax.random.normal(bkey, (big_b, layer_sizes[0]), jnp.float32)
    refb = simple_mlp_reference(xb, params)
    outb = jax.block_until_ready(simple_mlp_forward(xb, params))
    assert outb.shape == (big_b, layer_sizes[-1])
    assert jnp.allclose(outb, refb, atol=3e-2, rtol=3e-2), "big-batch mismatch"

    # 4) Multi-tile grid path (n_tiles=3, bb=128): exercises the batch-parallel
    #    pipeline, weight residency across steps, and packed-output unfold.
    outt = jax.block_until_ready(simple_mlp_forward(xb, params, block_b=128))
    assert outt.shape == (big_b, layer_sizes[-1])
    assert jnp.allclose(outt, refb, atol=3e-2, rtol=3e-2), "tiled mismatch"

    print("KERNEL_OK")
</pallas_src>

<mosaic_0001>
module attributes {stable_mosaic.version = 11 : i64} {
  func.func @_fused_mlp_kernel(%arg0: i32, %arg1: memref<8x32xf32, #tpu.memory_space<vmem>>, %arg2: memref<32x64xf32, #tpu.memory_space<vmem>>, %arg3: memref<1x64xf32, #tpu.memory_space<vmem>>, %arg4: memref<64x48xf32, #tpu.memory_space<vmem>>, %arg5: memref<1x48xf32, #tpu.memory_space<vmem>>, %arg6: memref<48x16xf32, #tpu.memory_space<vmem>>, %arg7: memref<1x16xf32, #tpu.memory_space<vmem>>, %arg8: memref<1x128xf32, #tpu.memory_space<vmem>>) attributes {dimension_semantics = [#tpu.dimension_semantics<parallel>], iteration_bounds = array<i64: 1>, scalar_prefetch = 0 : i64, scratch_operands = 0 : i64, tpu.core_type = #tpu.core_type<tc>, window_params = [{transform_indices = @transform_0, window_bounds = array<i64: 8, 32>}, {pipeline_mode = #tpu.pipeline_mode<synchronous>, transform_indices = @transform_1, window_bounds = array<i64: 32, 64>}, {pipeline_mode = #tpu.pipeline_mode<synchronous>, transform_indices = @transform_2, window_bounds = array<i64: 1, 64>}, {pipeline_mode = #tpu.pipeline_mode<synchronous>, transform_indices = @transform_3, window_bounds = array<i64: 64, 48>}, {pipeline_mode = #tpu.pipeline_mode<synchronous>, transform_indices = @transform_4, window_bounds = array<i64: 1, 48>}, {pipeline_mode = #tpu.pipeline_mode<synchronous>, transform_indices = @transform_5, window_bounds = array<i64: 48, 16>}, {pipeline_mode = #tpu.pipeline_mode<synchronous>, transform_indices = @transform_6, window_bounds = array<i64: 1, 16>}, {transform_indices = @transform_7, window_bounds = array<i64: 1, 128>}]} {
    %c0 = arith.constant 0 : index
    %c0_0 = arith.constant 0 : index
    %0 = vector.load %arg1[%c0, %c0_0] : memref<8x32xf32, #tpu.memory_space<vmem>>, vector<8x32xf32>
    %c0_1 = arith.constant 0 : index
    %c0_2 = arith.constant 0 : index
    %1 = vector.load %arg2[%c0_1, %c0_2] : memref<32x64xf32, #tpu.memory_space<vmem>>, vector<32x64xf32>
    %c0_3 = arith.constant 0 : index
    %c0_4 = arith.constant 0 : index
    %2 = vector.load %arg3[%c0_3, %c0_4] : memref<1x64xf32, #tpu.memory_space<vmem>>, vector<1x64xf32>
    %cst = arith.constant dense<0.000000e+00> : vector<8x64xf32>
    %3 = tpu.matmul %0, %1, %cst {dimension_numbers = #tpu.dot_dimension_numbers<[1], [0], [0], [1], [0, 0, 1, 1], [], []>} : vector<8x32xf32>, vector<32x64xf32>, vector<8x64xf32> -> vector<8x64xf32>
    %4 = vector.broadcast %2 : vector<1x64xf32> to vector<8x64xf32>
    %5 = arith.addf %3, %4 : vector<8x64xf32>
    %cst_5 = arith.constant 0.000000e+00 : f32
    %6 = vector.broadcast %cst_5 : f32 to vector<8x64xf32>
    %7 = arith.maximumf %5, %6 : vector<8x64xf32>
    %c0_6 = arith.constant 0 : index
    %c0_7 = arith.constant 0 : index
    %8 = vector.load %arg4[%c0_6, %c0_7] : memref<64x48xf32, #tpu.memory_space<vmem>>, vector<64x48xf32>
    %c0_8 = arith.constant 0 : index
    %c0_9 = arith.constant 0 : index
    %9 = vector.load %arg5[%c0_8, %c0_9] : memref<1x48xf32, #tpu.memory_space<vmem>>, vector<1x48xf32>
    %cst_10 = arith.constant dense<0.000000e+00> : vector<8x48xf32>
    %10 = tpu.matmul %7, %8, %cst_10 {dimension_numbers = #tpu.dot_dimension_numbers<[1], [0], [0], [1], [0, 0, 1, 1], [], []>} : vector<8x64xf32>, vector<64x48xf32>, vector<8x48xf32> -> vector<8x48xf32>
    %11 = vector.broadcast %9 : vector<1x48xf32> to vector<8x48xf32>
    %12 = arith.addf %10, %11 : vector<8x48xf32>
    %cst_11 = arith.constant 0.000000e+00 : f32
    %13 = vector.broadcast %cst_11 : f32 to vector<8x48xf32>
    %14 = arith.maximumf %12, %13 : vector<8x48xf32>
    %c0_12 = arith.constant 0 : index
    %c0_13 = arith.constant 0 : index
    %15 = vector.load %arg6[%c0_12, %c0_13] : memref<48x16xf32, #tpu.memory_space<vmem>>, vector<48x16xf32>
    %c0_14 = arith.constant 0 : index
    %c0_15 = arith.constant 0 : index
    %16 = vector.load %arg7[%c0_14, %c0_15] : memref<1x16xf32, #tpu.memory_space<vmem>>, vector<1x16xf32>
    %cst_16 = arith.constant dense<0.000000e+00> : vector<8x16xf32>
    %17 = tpu.matmul %14, %15, %cst_16 {dimension_numbers = #tpu.dot_dimension_numbers<[1], [0], [0], [1], [0, 0, 1, 1], [], []>} : vector<8x48xf32>, vector<48x16xf32>, vector<8x16xf32> -> vector<8x16xf32>
    %18 = vector.broadcast %16 : vector<1x16xf32> to vector<8x16xf32>
    %19 = arith.addf %17, %18 : vector<8x16xf32>
    %20 = vector.extract_strided_slice %19 {offsets = [0, 0], sizes = [1, 16], strides = [1, 1]} : vector<8x16xf32> to vector<1x16xf32>
    %c0_17 = arith.constant 0 : index
    %c0_18 = arith.constant 0 : index
    %21 = vector.load %arg8[%c0_17, %c0_18] : memref<1x128xf32, #tpu.memory_space<vmem>>, vector<1x16xf32>
    tpu.vector_store %arg8[%c0_17, %c0_18], %20 {strides = array<i32>} : memref<1x128xf32, #tpu.memory_space<vmem>>, vector<1x16xf32>,
    %22 = vector.extract_strided_slice %19 {offsets = [1, 0], sizes = [1, 16], strides = [1, 1]} : vector<8x16xf32> to vector<1x16xf32>
    %c0_19 = arith.constant 0 : index
    %c16 = arith.constant 16 : index
    %23 = vector.load %arg8[%c0_19, %c16] : memref<1x128xf32, #tpu.memory_space<vmem>>, vector<1x16xf32>
    tpu.vector_store %arg8[%c0_19, %c16], %22 {strides = array<i32>} : memref<1x128xf32, #tpu.memory_space<vmem>>, vector<1x16xf32>,
    %24 = vector.extract_strided_slice %19 {offsets = [2, 0], sizes = [1, 16], strides = [1, 1]} : vector<8x16xf32> to vector<1x16xf32>
    %c0_20 = arith.constant 0 : index
    %c32 = arith.constant 32 : index
    %25 = vector.load %arg8[%c0_20, %c32] : memref<1x128xf32, #tpu.memory_space<vmem>>, vector<1x16xf32>
    tpu.vector_store %arg8[%c0_20, %c32], %24 {strides = array<i32>} : memref<1x128xf32, #tpu.memory_space<vmem>>, vector<1x16xf32>,
    %26 = vector.extract_strided_slice %19 {offsets = [3, 0], sizes = [1, 16], strides = [1, 1]} : vector<8x16xf32> to vector<1x16xf32>
    %c0_21 = arith.constant 0 : index
    %c48 = arith.constant 48 : index
    %27 = vector.load %arg8[%c0_21, %c48] : memref<1x128xf32, #tpu.memory_space<vmem>>, vector<1x16xf32>
    tpu.vector_store %arg8[%c0_21, %c48], %26 {strides = array<i32>} : memref<1x128xf32, #tpu.memory_space<vmem>>, vector<1x16xf32>,
    %28 = vector.extract_strided_slice %19 {offsets = [4, 0], sizes = [1, 16], strides = [1, 1]} : vector<8x16xf32> to vector<1x16xf32>
    %c0_22 = arith.constant 0 : index
    %c64 = arith.constant 64 : index
    %29 = vector.load %arg8[%c0_22, %c64] : memref<1x128xf32, #tpu.memory_space<vmem>>, vector<1x16xf32>
    tpu.vector_store %arg8[%c0_22, %c64], %28 {strides = array<i32>} : memref<1x128xf32, #tpu.memory_space<vmem>>, vector<1x16xf32>,
    %30 = vector.extract_strided_slice %19 {offsets = [5, 0], sizes = [1, 16], strides = [1, 1]} : vector<8x16xf32> to vector<1x16xf32>
    %c0_23 = arith.constant 0 : index
    %c80 = arith.constant 80 : index
    %31 = vector.load %arg8[%c0_23, %c80] : memref<1x128xf32, #tpu.memory_space<vmem>>, vector<1x16xf32>
    tpu.vector_store %arg8[%c0_23, %c80], %30 {strides = array<i32>} : memref<1x128xf32, #tpu.memory_space<vmem>>, vector<1x16xf32>,
    %32 = vector.extract_strided_slice %19 {offsets = [6, 0], sizes = [1, 16], strides = [1, 1]} : vector<8x16xf32> to vector<1x16xf32>
    %c0_24 = arith.constant 0 : index
    %c96 = arith.constant 96 : index
    %33 = vector.load %arg8[%c0_24, %c96] : memref<1x128xf32, #tpu.memory_space<vmem>>, vector<1x16xf32>
    tpu.vector_store %arg8[%c0_24, %c96], %32 {strides = array<i32>} : memref<1x128xf32, #tpu.memory_space<vmem>>, vector<1x16xf32>,
    %34 = vector.extract_strided_slice %19 {offsets = [7, 0], sizes = [1, 16], strides = [1, 1]} : vector<8x16xf32> to vector<1x16xf32>
    %c0_25 = arith.constant 0 : index
    %c112 = arith.constant 112 : index
    %35 = vector.load %arg8[%c0_25, %c112] : memref<1x128xf32, #tpu.memory_space<vmem>>, vector<1x16xf32>
    tpu.vector_store %arg8[%c0_25, %c112], %34 {strides = array<i32>} : memref<1x128xf32, #tpu.memory_space<vmem>>, vector<1x16xf32>,
    return
  }
  func.func @transform_0(%arg0: i32) -> (i32, i32) {
    %c0_i32 = arith.constant 0 : i32
    %c0_i32_0 = arith.constant 0 : i32
    return %arg0, %c0_i32 : i32, i32
  }
  func.func @transform_1(%arg0: i32) -> (i32, i32) {
    %c0_i32 = arith.constant 0 : i32
    %c0_i32_0 = arith.constant 0 : i32
    %c0_i32_1 = arith.constant 0 : i32
    return %c0_i32, %c0_i32_0 : i32, i32
  }
  func.func @transform_2(%arg0: i32) -> (i32, i32) {
    %c0_i32 = arith.constant 0 : i32
    %c0_i32_0 = arith.constant 0 : i32
    %c0_i32_1 = arith.constant 0 : i32
    return %c0_i32, %c0_i32_0 : i32, i32
  }
  func.func @transform_3(%arg0: i32) -> (i32, i32) {
    %c0_i32 = arith.constant 0 : i32
    %c0_i32_0 = arith.constant 0 : i32
    %c0_i32_1 = arith.constant 0 : i32
    return %c0_i32, %c0_i32_0 : i32, i32
  }
  func.func @transform_4(%arg0: i32) -> (i32, i32) {
    %c0_i32 = arith.constant 0 : i32
    %c0_i32_0 = arith.constant 0 : i32
    %c0_i32_1 = arith.constant 0 : i32
    return %c0_i32, %c0_i32_0 : i32, i32
  }
  func.func @transform_5(%arg0: i32) -> (i32, i32) {
    %c0_i32 = arith.constant 0 : i32
    %c0_i32_0 = arith.constant 0 : i32
    %c0_i32_1 = arith.constant 0 : i32
    return %c0_i32, %c0_i32_0 : i32, i32
  }
  func.func @transform_6(%arg0: i32) -> (i32, i32) {
    %c0_i32 = arith.constant 0 : i32
    %c0_i32_0 = arith.constant 0 : i32
    %c0_i32_1 = arith.constant 0 : i32
    return %c0_i32, %c0_i32_0 : i32, i32
  }
  func.func @transform_7(%arg0: i32) -> (i32, i32) {
    %c0_i32 = arith.constant 0 : i32
    %c0_i32_0 = arith.constant 0 : i32
    return %arg0, %c0_i32 : i32, i32
  }
}

</mosaic_0001>

<bundles_post_ra>
// kernel: tpu_custom_call.1
= control target key start
LH: loop header
LB: loop body
LE: loop exit
PB: predicated region body
PF: predicated region fallthrough
CT: control target
= control target key end

     0   :  { %v477_v3 = vmov 0.0|0.0   ;;  %vm478_vm0 = vmmov 0   ;;  %v479_v6 = vmov 0.0   ;;  %s609_s0 = inlined_call_operand.vmem [shape: f32[8,32], index: 0, kind: input, shape index: {}]   ;;  %s610_s1 = inlined_call_operand.vmem [shape: f32[32,64], index: 1, kind: input, shape index: {}]   ;;  %s611_s2 = inlined_call_operand.vmem [shape: f32[1,64], index: 2, kind: input, shape index: {}]   ;;  %s612_s3 = inlined_call_operand.vmem [shape: f32[64,48], index: 3, kind: input, shape index: {}]   ;;  %s613_s4 = inlined_call_operand.vmem [shape: f32[1,48], index: 4, kind: input, shape index: {}]   ;;  %s614_s5 = inlined_call_operand.vmem [shape: f32[48,16], index: 5, kind: input, shape index: {}]   ;;  %s615_s6 = inlined_call_operand.vmem [shape: f32[1,16], index: 6, kind: input, shape index: {}]   ;;  %s616_s7 = inlined_call_operand.hbm [shape: f32[1,128], index: 7, kind: output, shape index: {}]  }
   0x1   :  { %v28_v0 = vld [vmem:[%s610_s1] sm:$0xff]  ;;  %v29_v1 = vld [vmem:[%s610_s1 + $0x8] sm:$0xff]  ;;  %v30_v2 = vld [vmem:[%s610_s1 + $0x10] sm:$0xff]  ;;  %415 = vmatprep.subr.bf16.mxu0 %v477_v3  ;;  %378 = vmatprep.mubr.msk.f32.mxu0 %vm478_vm0, %v479_v6 }
   0x2   :  { %v416_v4 = vpack.c.bf16 %v29_v1, %v28_v0  ;;  %v31_v5 = vld [vmem:[%s610_s1 + $0x18] sm:$0xff]  ;;  %v114_v7 = vld [vmem:[%s612_s3] sm:$0xff]  ;;  %421 = vmatprep.subr.bf16.mxu1 %v477_v3  ;;  %v115_v8 = vld [vmem:[%s612_s3 + $0x8] sm:$0xff]  ;;  %397 = vmatprep.mubr.msk.f32.mxu1 %vm478_vm0, %v479_v6 }
   0x3   :  { %v116_v9 = vld [vmem:[%s612_s3 + $0x10] sm:$0xff]  ;;  %v117_v10 = vld [vmem:[%s612_s3 + $0x18] sm:$0xff]  ;;  %v419_v11 = vpack.c.bf16 %v31_v5, %v30_v2  ;;  %v422_v12 = vpack.c.bf16 %v115_v8, %v114_v7 }
   0x4   :  { %417 = vmatpush3.bf16.msra.mxu0 %v416_v4 }
   0x5   :  { %418 = vmatprep.subr.bf16.mxu0 %v477_v3 }
   0x6   :  { %12 = vsyncpa [#allocation3], 0  ;;  %423 = vmatpush3.bf16.msra.mxu1 %v422_v12  ;;  %v425_v13 = vpack.c.bf16 %v117_v10, %v116_v9  ;;  %v118_v14 = vld [vmem:[%s612_s3 + $0x20] sm:$0xff]  ;;  %v119_v15 = vld [vmem:[%s612_s3 + $0x28] sm:$0xff]  ;;  %vm39_vm1 = vcmask 261120   ;;  %vm129_vm2 = vcmask 523264  }
   0x7   :  { %424 = vmatprep.subr.bf16.mxu1 %v477_v3  ;;  %v27_v16 = vld [vmem:[%s609_s0] sm:$0xff]  ;;  %v428_v17 = vpack.c.bf16 %v119_v15, %v118_v14  ;;  %v120_v18 = vld [vmem:[%s612_s3 + $0x30] sm:$0xff]  ;;  %v121_v19 = vld [vmem:[%s612_s3 + $0x38] sm:$0xff]  ;;  %vm217_vm3 = vcmask 392192   ;;  %vm291_vm4 = vcmask 122880   ;;  %s481_s17 = smov 16  }
   0x8   :  { %420 = vmatpush3.bf16.msra.mxu0 %v419_v11  ;;  %v431_v20 = vpack.c.bf16 %v121_v19, %v120_v18  ;;  %v204_v21 = vld [vmem:[%s614_s5] sm:$0xff]  ;;  %v205_v22 = vld [vmem:[%s614_s5 + $0x8] sm:$0xff]  ;;  %v206_v23 = vld [vmem:[%s614_s5 + $0x10] sm:$0xff]  ;;  %s483_s18 = smov 32   ;;  %s484_s19 = smov 96   ;;  %vm297_vm5 = vcmask 255105  }
   0x9   :  { %433 = vmatprep.subr.bf16.mxu0 %v477_v3  ;;  %v434_v24 = vpack.c.bf16 %v205_v22, %v204_v21  ;;  %v207_v25 = vld [vmem:[%s614_s5 + $0x18] sm:$0xff]  ;;  %v343_v27 = vld [vmem:[%s611_s2] ss:$0 sm:$0xff]  ;;  %v209_v33 = vld [vmem:[%s614_s5 + $0x28] sm:$0xff]  ;;  %s485_s20 = smov 80   ;;  %s486_s21 = smov 112  }
   0xa   :  { %426 = vmatpush3.bf16.msra.mxu1 %v425_v13  ;;  %v437_v26 = vpack.c.bf16 %v207_v25, %v206_v23  ;;  %v208_v32 = vld [vmem:[%s614_s5 + $0x20] sm:$0xff]  ;;  %s480_s5 = smov 48   ;;  %vm302_vm6 = vcmask 387330   ;;  %vm307_vm7 = vcmask 519555   ;;  %vm312_vm8 = vcmask 651780  }
   0xb   :  { %379 = vmatmul.mubr.msk.f32.vlgmr.msra.gmra.mrb[0].mxu0 %vm39_vm1, %v27_v16  ;;  %427 = vmatprep.subr.bf16.mxu1 %v477_v3  ;;  %v440_v34 = vpack.c.bf16 %v209_v33, %v208_v32  ;;  %v345_v35 = vld [vmem:[%s613_s4] ss:$0 sm:$0xff]  ;;  %s482_s4 = smov 64   ;;  %vm317_vm9 = vcmask 784005   ;;  %vm322_vm10 = vcmask 916230   ;;  %vm327_vm11 = vcmask 1048455  }
   0xc   :  { %412 = vmatprep.mubr.msk.f32.mxu0 %vm478_vm0, %v479_v6  ;;  %435 = vmatpush3.bf16.msra.mxu0 %v434_v24  ;;  %v347_v40 = vld [vmem:[%s615_s6] ss:$0 sm:$0xff]  ;;  %s487_s6 = smov [#allocation2]  }
   0xd   :  { %436 = vmatprep.subr.bf16.mxu0 %v477_v3  ;;  %s335_s22 = sshll.u32 %s487_s6, 4  ;;  %s336_s22 = int_to_ptr.vmem [resolvable:$true] %s335_s22 }
   0xe   :  { %429 = vmatpush3.bf16.msra.mxu1 %v428_v17  ;;  %s453_s23 = scalar_lea.vmem %s336_s22, 16  ;;  %s457_s24 = scalar_lea.vmem %s336_s22, 32 }
   0xf   :  { %430 = vmatprep.subr.bf16.mxu1 %v477_v3  ;;  %p454_p0 = scmp.ne.s32.totalorder %s336_s22, %s453_s23  ;;  %p458_p1 = scmp.lt.s32.totalorder %s336_s22, %s336_s22 }
  0x10   :  { %438 = vmatpush3.bf16.msra.mxu0 %v437_v26  ;;  %p459_p2 = scmp.lt.s32.totalorder %s457_s24, %s453_s23 }
  0x11   :  { %439 = vmatprep.subr.bf16.mxu0 %v477_v3 }
  0x12   :  { %432 = vmatpush3.bf16.msra.mxu1 %v431_v20  ;;  %p460_p3 = por %p459_p2, %p458_p1 }
  0x14   :  { %441 = vmatpush3.bf16.msra.mxu0 %v440_v34  ;;  %p461_p4 = pnand %p460_p3, %p454_p0 }
  0xde   :  { %v109_v28 = vpop.f32.mrb[0].mxu0 }
  0xdf   :  { %v110_v29 = vadd.f32 %v343_v27, %v109_v28  ;;  %v380_v30 = vpop.f32.mrb[1].mxu0 }
  0xe1   :  { %v113_v31 = vmax.f32 %v110_v29, 0.0 }
  0xe3   :  { %398 = vmatmul.mubr.msk.f32.vlgmr.msra.gmra.mrb[0].mxu1 %vm129_vm2, %v113_v31 }
 0x1b6   :  { %v199_v36 = vpop.f32.mrb[0].mxu1 }
 0x1b7   :  { %v200_v37 = vadd.f32 %v345_v35, %v199_v36  ;;  %v399_v38 = vpop.f32.mrb[1].mxu1 }
 0x1b9   :  { %v203_v39 = vmax.f32 %v200_v37, 0.0 }
 0x1bb   :  { %413 = vmatmul.mubr.msk.f32.vlgmr.msra.gmra.mrb[2].mxu0 %vm217_vm3, %v203_v39 }
 0x28e   :  { %v287_v41 = vpop.f32.mrb[2].mxu0 }
 0x28f   :  { %v288_v42 = vadd.f32 %v347_v40, %v287_v41  ;;  %v414_v43 = vpop.f32.mrb[3].mxu0 }
 0x291   :  { %304 = vrot.lane.b32.xlu1 %v288_v42, %s480_s5  ;;  %294 = vrot.lane.b32.xlu0 %v288_v42, %s481_s17  ;;  %292 = vst.msk [vmem:[#allocation2] sm:$0x1] %vm291_vm4, %v288_v42 }
 0x295   :  { %309 = vrot.lane.b32.xlu1 %v288_v42, %s482_s4  ;;  %299 = vrot.lane.b32.xlu0 %v288_v42, %s483_s18 }
 0x299   :  { %319 = vrot.lane.b32.xlu1 %v288_v42, %s484_s19  ;;  %314 = vrot.lane.b32.xlu0 %v288_v42, %s485_s20 }
 0x29d   :  { %324 = vrot.lane.b32.xlu0 %v288_v42, %s486_s21 }
 0x303   :  { %v305_v44 = vpop.permute.xlu1 %304  ;;  %v295_v45 = vpop.permute.xlu0 %294 }
 0x304   :  { %298 = vst.msk [vmem:[#allocation2 - $0x1] sm:$0x2] %vm297_vm5, %v295_v45 }
 0x307   :  { %v310_v46 = vpop.permute.xlu1 %309  ;;  %v300_v47 = vpop.permute.xlu0 %299 }
 0x308   :  { %303 = vst.msk [vmem:[#allocation2 - $0x2] sm:$0x4] %vm302_vm6, %v300_v47 }
 0x309   :  { %308 = vst.msk [vmem:[#allocation2 - $0x3] sm:$0x8] %vm307_vm7, %v305_v44 }
 0x30a   :  { %313 = vst.msk [vmem:[#allocation2 - $0x4] sm:$0x10] %vm312_vm8, %v310_v46 }
 0x30b   :  { %v320_v48 = vpop.permute.xlu1 %319  ;;  %v315_v49 = vpop.permute.xlu0 %314 }
 0x30c   :  { %318 = vst.msk [vmem:[#allocation2 - $0x5] sm:$0x20] %vm317_vm9, %v315_v49 }
 0x30d   :  { %323 = vst.msk [vmem:[#allocation2 - $0x6] sm:$0x40] %vm322_vm10, %v320_v48 }
 0x30f   :  { %v325_v50 = vpop.permute.xlu0 %324 }
 0x310   :  { %328 = vst.msk [vmem:[#allocation2 - $0x7] sm:$0x80] %vm327_vm11, %v325_v50 }
 0x311   :  { %464 = shalt.err (!%p461_p4)
}
 0x312   :  { %s465_s26 = scalar_lea.hbm %s616_s7, 16 }
 0x313   :  { %p466_p5 = scmp.ne.s32.totalorder %s616_s7, %s465_s26  ;;  %p469_p6 = scmp.lt.u32.totalorder %s465_s26, %s616_s7 }
 0x315   :  { %p471_p7 = pnand %p469_p6, %p466_p5 }
 0x317   :  { %474 = shalt.err (!%p471_p7)
}
 0x318   :  { %338 = dma.vmem_to_hbm [thread:$0]  %s336_s22, 16, %s616_s7, [#allocation3]  }
 0x319   :  { %475 = dma.done.wait [#allocation3], 16  }
 0x31a   :  { %476 = vsyncadd [#allocation3], 4294967280 }
 0x31b   :  { %342 = vsyncpa [#allocation3], 1 }

</bundles_post_ra>
